<compile_context>
chip_gen: v7x
topology: tpu7x:2x2x1
jax: 0.10.0
libtpu: 0.0.40
codegen_flags: <defaults>
</compile_context>

<pallas_src>
import jax
import jax.numpy as jnp
from jax import lax
from jax.experimental import pallas as pl
from jax.experimental.pallas import tpu as pltpu

_EPS = 1e-5
_MIB = 1024 * 1024


def _round_up(x, m):
    return ((x + m - 1) // m) * m


def _vmem_budgets():
    """(x_block_budget_bytes, vmem_limit_bytes), tuned per TPU generation."""
    try:
        cap = int(pltpu.get_tpu_info().vmem_capacity_bytes)
    except Exception:
        cap = 128 * _MIB
    if cap >= 96 * _MIB:                       # v5e / v6e: 128 MiB physical VMEM
        return 8 * _MIB, 64 * _MIB
    return 4 * _MIB, min(48 * _MIB, (cap * 3) // 4)   # v7x: 64 MiB physical


def _pick_hw_tile(hw, r_pad, itemsize, block_budget):
    """Largest lane tile (multiple of 128, or full HW) whose x-block fits the budget."""
    hw_pad = _round_up(hw, 128)
    if hw <= 128 or r_pad * hw_pad * itemsize <= block_budget:
        return hw
    max_lanes = (block_budget // (r_pad * itemsize)) // 128 * 128
    max_lanes = max(128, min(max_lanes, hw_pad))
    if max_lanes >= hw:
        return hw
    if hw % 128 == 0:
        divisors = [t for t in range(128, max_lanes + 1, 128) if hw % t == 0]
        if divisors and 2 * max(divisors) >= max_lanes:
            return max(divisors)               # exact tiling, no masked tail
    return max_lanes                           # masked tail handled in-kernel


# ----------------------------------------------------------------------------
# Kernels
# ----------------------------------------------------------------------------
def _make_stats_kernel(hw, thw, tiles_per_core, need_mask):
    """Pass 1: per-row (n*C+c) sum / sum-of-squares, accumulated over HW tiles."""

    def kernel(x_ref, acc_ref):
        # acc_ref: (1, 2, R) resident f32 partial accumulator for this core.
        @pl.when(pl.program_id(1) == 0)
        def _():
            acc_ref[...] = jnp.zeros_like(acc_ref)

        x = x_ref[...].astype(jnp.float32)                      # (R, thw)
        if need_mask:
            start = (pl.program_id(0) * tiles_per_core + pl.program_id(1)) * thw
            lane = lax.broadcasted_iota(jnp.int32, x.shape, 1)
            x = jnp.where(start + lane < hw, x, 0.0)
        acc_ref[:, 0:1, :] += jnp.sum(x, axis=1)[None, None, :]
        acc_ref[:, 1:2, :] += jnp.sum(x * x, axis=1)[None, None, :]

    return kernel


def _norm_kernel(scale_ref, shift_ref, x_ref, o_ref):
    """Pass 2: out = x * scale + shift (one FMA per element, lane-dense)."""
    x = x_ref[...].astype(jnp.float32)                          # (R, thw)
    o_ref[...] = (x * scale_ref[...] + shift_ref[...]).astype(o_ref.dtype)


def _make_fused_kernel(count):
    """Single pass for VMEM-resident activations: stats + finalize + normalize."""
    inv_count = 1.0 / count

    def kernel(x_ref, gamma_ref, beta_ref, amat_ref, o_ref):
        x = x_ref[...].astype(jnp.float32)                      # (R, HW)
        s_row = jnp.sum(x, axis=1)[None, :]                     # (1, R) per-row sum
        ss_row = jnp.sum(x * x, axis=1)[None, :]                # (1, R) per-row sumsq
        a = amat_ref[...]                                       # (R, R) same-channel mask
        chan_sum = jnp.sum(a * s_row, axis=1, keepdims=True)    # (R, 1) per-channel sum
        chan_ss = jnp.sum(a * ss_row, axis=1, keepdims=True)    # (R, 1)
        mean = chan_sum * inv_count
        var = jnp.maximum(chan_ss * inv_count - mean * mean, 0.0)
        inv = lax.rsqrt(var + _EPS)
        scale = gamma_ref[...] * inv                            # (R, 1)
        shift = beta_ref[...] - scale * mean
        o_ref[...] = (x * scale + shift).astype(o_ref.dtype)

    return kernel


# ----------------------------------------------------------------------------
# Wrapper
# ----------------------------------------------------------------------------
def conditional_batch_norm_2d(x_nchw, z, gamma_w, gamma_b, beta_w, beta_b,
                              *, hw_tile=None, force_two_pass=False):
    """x_nchw: (N, C, H, W); z: (N, L); gamma_w/beta_w: (C, L); gamma_b/beta_b: (C,)."""
    N, C, H, W = x_nchw.shape
    L = z.shape[1]
    assert gamma_w.shape == (C, L) and beta_w.shape == (C, L)
    HW = H * W
    R = N * C

    # Flatten (N, C) onto sublanes and (H, W) onto lanes: pure reshape, no
    # transpose / extra HBM pass, sublane-dense even when C < 8.
    x = x_nchw.reshape(R, HW)

    # Tiny (N,L)x(L,C) conditional-affine matmuls, hoisted out of the kernels.
    zf = z.astype(jnp.float32)
    gamma = zf @ gamma_w.T.astype(jnp.float32) + gamma_b.astype(jnp.float32)  # (N, C)
    beta = zf @ beta_w.T.astype(jnp.float32) + beta_b.astype(jnp.float32)     # (N, C)
    gamma_r = gamma.reshape(R, 1)
    beta_r = beta.reshape(R, 1)

    itemsize = jnp.dtype(x_nchw.dtype).itemsize
    r_pad = _round_up(R, 8)
    hw_pad = _round_up(HW, 128)
    block_budget, vmem_limit = _vmem_budgets()
    count = float(N * HW)

    # ---- Fused single-pass path (2x HBM traffic instead of 3x) -------------
    fused_bytes = (r_pad * hw_pad * (4 * itemsize + 12)        # in/out bufs + f32 temps
                   + r_pad * _round_up(R, 128) * 4)            # same-channel mask
    if (not force_two_pass) and hw_tile is None and fused_bytes <= vmem_limit // 3:
        chan = jnp.arange(R, dtype=jnp.int32) % C
        amat = (chan[:, None] == chan[None, :]).astype(jnp.float32)   # (R, R)
        out = pl.pallas_call(
            _make_fused_kernel(count),
            out_shape=jax.ShapeDtypeStruct((R, HW), x_nchw.dtype),
            grid_spec=pltpu.PrefetchScalarGridSpec(
                num_scalar_prefetch=0,
                grid=(1,),
                in_specs=[
                    pl.BlockSpec((R, HW), lambda i: (0, 0)),
                    pl.BlockSpec((R, 1), lambda i: (0, 0)),
                    pl.BlockSpec((R, 1), lambda i: (0, 0)),
                    pl.BlockSpec((R, R), lambda i: (0, 0)),
                ],
                out_specs=pl.BlockSpec((R, HW), lambda i: (0, 0)),
            ),
            compiler_params=pltpu.CompilerParams(
                dimension_semantics=("arbitrary",),
                vmem_limit_bytes=vmem_limit,
            ),
            cost_estimate=pl.CostEstimate(
                flops=7 * R * HW, transcendentals=R,
                bytes_accessed=2 * R * HW * itemsize),
        )(x, gamma_r, beta_r, amat)
        return out.reshape(N, C, H, W)

    # ---- Two-pass path ------------------------------------------------------
    if hw_tile is None:
        thw = _pick_hw_tile(HW, r_pad, itemsize, block_budget)
    else:
        thw = int(hw_tile)
        assert thw == HW or (thw % 128 == 0 and thw <= HW), \
            "hw_tile must be a multiple of 128 or equal to H*W"
    total_tiles = -(-HW // thw)
    need_mask = (HW % thw) != 0
    P = 2 if (total_tiles % 2 == 0 and total_tiles >= 2) else 1   # shard stats across 2 TCs (v7x)
    T = total_tiles // P

    # Pass 1: per-row sum / sum-of-squares partials, one (1,2,R) slab per core.
    stats = pl.pallas_call(
        _make_stats_kernel(HW, thw, T, need_mask),
        out_shape=jax.ShapeDtypeStruct((P, 2, R), jnp.float32),
        grid_spec=pltpu.PrefetchScalarGridSpec(
            num_scalar_prefetch=0,
            grid=(P, T),
            in_specs=[pl.BlockSpec((R, thw), lambda p, t: (0, p * T + t))],
            out_specs=pl.BlockSpec((1, 2, R), lambda p, t: (p, 0, 0)),
        ),
        compiler_params=pltpu.CompilerParams(
            dimension_semantics=("parallel", "arbitrary"),
            vmem_limit_bytes=vmem_limit,
        ),
        cost_estimate=pl.CostEstimate(
            flops=3 * R * HW, transcendentals=0,
            bytes_accessed=R * HW * itemsize + P * 2 * R * 4),
    )(x)

    # Finalize (tiny) and fold mean / rsqrt(var+eps) / gamma / beta into one
    # scale + shift per (n, c) row.
    tot = jnp.sum(stats, axis=0)                                # (2, R)
    chan_sum = jnp.sum(tot[0].reshape(N, C), axis=0)            # (C,)
    chan_ss = jnp.sum(tot[1].reshape(N, C), axis=0)             # (C,)
    mean = chan_sum / count
    var = jnp.maximum(chan_ss / count - mean * mean, 0.0)       # clamp cancellation
    inv = lax.rsqrt(var + _EPS)
    scale = (gamma * inv[None, :]).reshape(R, 1)
    shift = (beta - gamma * inv[None, :] * mean[None, :]).reshape(R, 1)

    # Pass 2: out = x * scale + shift; tiles independent -> megacore "parallel".
    out = pl.pallas_call(
        _norm_kernel,
        out_shape=jax.ShapeDtypeStruct((R, HW), x_nchw.dtype),
        grid_spec=pltpu.PrefetchScalarGridSpec(
            num_scalar_prefetch=0,
            grid=(total_tiles,),
            in_specs=[
                pl.BlockSpec((R, 1), lambda t: (0, 0)),          # scale (lane splat)
                pl.BlockSpec((R, 1), lambda t: (0, 0)),          # shift
                pl.BlockSpec((R, thw), lambda t: (0, t)),        # x tile
            ],
            out_specs=pl.BlockSpec((R, thw), lambda t: (0, t)),
        ),
        compiler_params=pltpu.CompilerParams(
            dimension_semantics=("parallel",),
            vmem_limit_bytes=vmem_limit,
        ),
        cost_estimate=pl.CostEstimate(
            flops=2 * R * HW, transcendentals=0,
            bytes_accessed=2 * R * HW * itemsize + 2 * R * 4),
    )(scale, shift, x)
    return out.reshape(N, C, H, W)


# ----------------------------------------------------------------------------
# Reference + self-test
# ----------------------------------------------------------------------------
def _reference(x_nchw, z, gamma_w, gamma_b, beta_w, beta_b):
    """Pure-JAX reference matching the PyTorch forward semantics (NCHW)."""
    mean = jnp.mean(x_nchw, axis=(0, 2, 3), keepdims=True)
    var = jnp.mean((x_nchw - mean) ** 2, axis=(0, 2, 3), keepdims=True)
    x_hat = (x_nchw - mean) / jnp.sqrt(var + _EPS)
    gamma = (z @ gamma_w.T + gamma_b)[:, :, None, None]
    beta = (z @ beta_w.T + beta_b)[:, :, None, None]
    return gamma * x_hat + beta


if __name__ == "__main__":
    key = jax.random.PRNGKey(0)
    k1, k2, k3, k4, k5, k6 = jax.random.split(key, 6)

    # Case 1: module-implied small shapes (N=2, C=4, 16x16, latent=8) with the
    # module's deterministic init (gamma W=1/b=0, beta W=0/b=0).
    N, C, H, W, L = 2, 4, 16, 16, 8
    x = jax.random.normal(k1, (N, C, H, W), dtype=jnp.float32)
    z = jax.random.normal(k2, (N, L), dtype=jnp.float32)
    gamma_w = jnp.ones((C, L), jnp.float32)
    gamma_b = jnp.zeros((C,), jnp.float32)
    beta_w = jnp.zeros((C, L), jnp.float32)
    beta_b = jnp.zeros((C,), jnp.float32)
    ref = _reference(x, z, gamma_w, gamma_b, beta_w, beta_b)

    out = jax.block_until_ready(
        conditional_batch_norm_2d(x, z, gamma_w, gamma_b, beta_w, beta_b))
    assert out.shape == (N, C, H, W)
    assert jnp.allclose(out, ref, atol=1e-4, rtol=1e-4), "fused path mismatch"

    out2 = jax.block_until_ready(
        conditional_batch_norm_2d(x, z, gamma_w, gamma_b, beta_w, beta_b,
                                  force_two_pass=True, hw_tile=128))
    assert jnp.allclose(out2, ref, atol=1e-4, rtol=1e-4), "two-pass path mismatch"

    # Case 2: non-128-aligned spatial (20x20), C < 8, non-trivial affine
    # weights. Exercises the masked-tail stats path and cross-core partials.
    N2, C2, H2, W2 = 2, 3, 20, 20
    x2 = jax.random.normal(k3, (N2, C2, H2, W2), dtype=jnp.float32)
    z2 = jax.random.normal(k4, (N2, L), dtype=jnp.float32)
    gw2 = 0.5 * jax.random.normal(k5, (C2, L), dtype=jnp.float32) + 1.0
    gb2 = jnp.zeros((C2,), jnp.float32)
    bw2 = 0.5 * jax.random.normal(k6, (C2, L), dtype=jnp.float32)
    bb2 = jnp.zeros((C2,), jnp.float32)
    ref2 = _reference(x2, z2, gw2, gb2, bw2, bb2)

    out3 = jax.block_until_ready(
        conditional_batch_norm_2d(x2, z2, gw2, gb2, bw2, bb2))
    assert jnp.allclose(out3, ref2, atol=1e-4, rtol=1e-4), "fused (case 2) mismatch"

    out4 = jax.block_until_ready(
        conditional_batch_norm_2d(x2, z2, gw2, gb2, bw2, bb2,
                                  force_two_pass=True, hw_tile=128))
    assert jnp.allclose(out4, ref2, atol=1e-4, rtol=1e-4), "masked two-pass mismatch"

    print("KERNEL_OK")
</pallas_src>

<mosaic_0001>
module attributes {stable_mosaic.version = 11 : i64} {
  func.func @kernel(%arg0: i32, %arg1: memref<8x256xf32, #tpu.memory_space<vmem>>, %arg2: memref<8x1xf32, #tpu.memory_space<vmem>>, %arg3: memref<8x1xf32, #tpu.memory_space<vmem>>, %arg4: memref<8x8xf32, #tpu.memory_space<vmem>>, %arg5: memref<8x256xf32, #tpu.memory_space<vmem>>) attributes {dimension_semantics = [#tpu.dimension_semantics<arbitrary>], iteration_bounds = array<i64: 1>, scalar_prefetch = 0 : i64, scratch_operands = 0 : i64, tpu.core_type = #tpu.core_type<tc>, window_params = [{pipeline_mode = #tpu.pipeline_mode<synchronous>, transform_indices = @transform_0, window_bounds = array<i64: 8, 256>}, {pipeline_mode = #tpu.pipeline_mode<synchronous>, transform_indices = @transform_1, window_bounds = array<i64: 8, 1>}, {pipeline_mode = #tpu.pipeline_mode<synchronous>, transform_indices = @transform_2, window_bounds = array<i64: 8, 1>}, {pipeline_mode = #tpu.pipeline_mode<synchronous>, transform_indices = @transform_3, window_bounds = array<i64: 8, 8>}, {pipeline_mode = #tpu.pipeline_mode<synchronous>, transform_indices = @transform_4, window_bounds = array<i64: 8, 256>}]} {
    %c0 = arith.constant 0 : index
    %c0_0 = arith.constant 0 : index
    %0 = vector.load %arg1[%c0, %c0_0] : memref<8x256xf32, #tpu.memory_space<vmem>>, vector<8x256xf32>
    %cst = arith.constant dense<0.000000e+00> : vector<8xf32>
    %1 = vector.multi_reduction <add>, %0, %cst [1] : vector<8x256xf32> to vector<8xf32>
    %2 = vector.shape_cast %1 : vector<8xf32> to vector<1x8xf32>
    %3 = arith.mulf %0, %0 : vector<8x256xf32>
    %cst_1 = arith.constant dense<0.000000e+00> : vector<8xf32>
    %4 = vector.multi_reduction <add>, %3, %cst_1 [1] : vector<8x256xf32> to vector<8xf32>
    %5 = vector.shape_cast %4 : vector<8xf32> to vector<1x8xf32>
    %c0_2 = arith.constant 0 : index
    %c0_3 = arith.constant 0 : index
    %6 = vector.load %arg4[%c0_2, %c0_3] : memref<8x8xf32, #tpu.memory_space<vmem>>, vector<8x8xf32>
    %7 = vector.broadcast %2 : vector<1x8xf32> to vector<8x8xf32>
    %8 = arith.mulf %6, %7 : vector<8x8xf32>
    %cst_4 = arith.constant dense<0.000000e+00> : vector<8xf32>
    %9 = vector.multi_reduction <add>, %8, %cst_4 [1] : vector<8x8xf32> to vector<8xf32>
    %10 = vector.shape_cast %9 : vector<8xf32> to vector<8x1xf32>
    %11 = vector.broadcast %5 : vector<1x8xf32> to vector<8x8xf32>
    %12 = arith.mulf %6, %11 : vector<8x8xf32>
    %cst_5 = arith.constant dense<0.000000e+00> : vector<8xf32>
    %13 = vector.multi_reduction <add>, %12, %cst_5 [1] : vector<8x8xf32> to vector<8xf32>
    %14 = vector.shape_cast %13 : vector<8xf32> to vector<8x1xf32>
    %cst_6 = arith.constant 0.001953125 : f32
    %15 = vector.broadcast %cst_6 : f32 to vector<8x1xf32>
    %16 = arith.mulf %10, %15 : vector<8x1xf32>
    %cst_7 = arith.constant 0.001953125 : f32
    %17 = vector.broadcast %cst_7 : f32 to vector<8x1xf32>
    %18 = arith.mulf %14, %17 : vector<8x1xf32>
    %19 = arith.mulf %16, %16 : vector<8x1xf32>
    %20 = arith.subf %18, %19 : vector<8x1xf32>
    %cst_8 = arith.constant 0.000000e+00 : f32
    %21 = vector.broadcast %cst_8 : f32 to vector<8x1xf32>
    %22 = arith.maximumf %20, %21 : vector<8x1xf32>
    %cst_9 = arith.constant 9.99999974E-6 : f32
    %23 = vector.broadcast %cst_9 : f32 to vector<8x1xf32>
    %24 = arith.addf %22, %23 : vector<8x1xf32>
    %25 = math.rsqrt %24 : vector<8x1xf32>
    %c0_10 = arith.constant 0 : index
    %c0_11 = arith.constant 0 : index
    %26 = vector.load %arg2[%c0_10, %c0_11] : memref<8x1xf32, #tpu.memory_space<vmem>>, vector<8x1xf32>
    %27 = arith.mulf %26, %25 : vector<8x1xf32>
    %c0_12 = arith.constant 0 : index
    %c0_13 = arith.constant 0 : index
    %28 = vector.load %arg3[%c0_12, %c0_13] : memref<8x1xf32, #tpu.memory_space<vmem>>, vector<8x1xf32>
    %29 = arith.mulf %27, %16 : vector<8x1xf32>
    %30 = arith.subf %28, %29 : vector<8x1xf32>
    %31 = vector.broadcast %27 : vector<8x1xf32> to vector<8x256xf32>
    %32 = arith.mulf %0, %31 : vector<8x256xf32>
    %33 = vector.broadcast %30 : vector<8x1xf32> to vector<8x256xf32>
    %34 = arith.addf %32, %33 : vector<8x256xf32>
    %c0_14 = arith.constant 0 : index
    %c0_15 = arith.constant 0 : index
    %35 = vector.load %arg5[%c0_14, %c0_15] : memref<8x256xf32, #tpu.memory_space<vmem>>, vector<8x256xf32>
    tpu.vector_store %arg5[%c0_14, %c0_15], %34 {strides = array<i32>} : memref<8x256xf32, #tpu.memory_space<vmem>>, vector<8x256xf32>,
    return
  }
  func.func @transform_0(%arg0: i32) -> (i32, i32) {
    %c0_i32 = arith.constant 0 : i32
    %c0_i32_0 = arith.constant 0 : i32
    %c0_i32_1 = arith.constant 0 : i32
    return %c0_i32, %c0_i32_0 : i32, i32
  }
  func.func @transform_1(%arg0: i32) -> (i32, i32) {
    %c0_i32 = arith.constant 0 : i32
    %c0_i32_0 = arith.constant 0 : i32
    %c0_i32_1 = arith.constant 0 : i32
    return %c0_i32, %c0_i32_0 : i32, i32
  }
  func.func @transform_2(%arg0: i32) -> (i32, i32) {
    %c0_i32 = arith.constant 0 : i32
    %c0_i32_0 = arith.constant 0 : i32
    %c0_i32_1 = arith.constant 0 : i32
    return %c0_i32, %c0_i32_0 : i32, i32
  }
  func.func @transform_3(%arg0: i32) -> (i32, i32) {
    %c0_i32 = arith.constant 0 : i32
    %c0_i32_0 = arith.constant 0 : i32
    %c0_i32_1 = arith.constant 0 : i32
    return %c0_i32, %c0_i32_0 : i32, i32
  }
  func.func @transform_4(%arg0: i32) -> (i32, i32) {
    %c0_i32 = arith.constant 0 : i32
    %c0_i32_0 = arith.constant 0 : i32
    %c0_i32_1 = arith.constant 0 : i32
    return %c0_i32, %c0_i32_0 : i32, i32
  }
}

</mosaic_0001>

<bundles_post_ra>
// kernel: tpu_custom_call.1
= control target key start
LH: loop header
LB: loop body
LE: loop exit
PB: predicated region body
PF: predicated region fallthrough
CT: control target
= control target key end

     0   :  { %9 = vsyncpa [#allocation3], 0  ;;  %s381_s0 = inlined_call_operand.hbm [shape: f32[8,256], index: 0, kind: input, shape index: {}]   ;;  %s382_s1 = inlined_call_operand.hbm [shape: f32[8,1], index: 1, kind: input, shape index: {}]   ;;  %s383_s2 = inlined_call_operand.hbm [shape: f32[8,1], index: 2, kind: input, shape index: {}]   ;;  %s384_s3 = inlined_call_operand.hbm [shape: f32[8,8], index: 3, kind: input, shape index: {}]   ;;  %s385_s4 = inlined_call_operand.hbm [shape: f32[8,256], index: 4, kind: output, shape index: {}]  }
   0x1   :  { %10 = vsyncpa [#allocation6], 0 }
   0x2   :  { %11 = vsyncpa [#allocation9], 0 }
   0x3   :  { %12 = vsyncpa [#allocation4], 0  ;;  %s290_s15 = smov [#allocation5]   ;;  %s291_s17 = smov [#allocation2]  }
   0x4   :  { %s29_s16 = sshll.u32 %s290_s15, 4  ;;  %s19_s18 = sshll.u32 %s291_s17, 4  ;;  %s30_s16 = int_to_ptr.vmem [resolvable:$true] %s29_s16  ;;  %s20_s18 = int_to_ptr.vmem [resolvable:$true] %s19_s18 }
   0x5   :  { %s172_s21 = scalar_lea.hbm %s382_s1, 128 }
   0x6   :  { %p173_p0 = scmp.ne.s32.totalorder %s382_s1, %s172_s21  ;;  %p176_p1 = scmp.lt.u32.totalorder %s172_s21, %s382_s1 }
   0x8   :  { %p178_p2 = pnand %p176_p1, %p173_p0 }
   0xa   :  { %181 = shalt.err (!%p178_p2)
}
   0xb   :  { %s182_s26 = scalar_lea.vmem %s30_s16, 128  ;;  %p187_p4 = scmp.lt.s32.totalorder %s30_s16, %s30_s16 }
   0xc   :  { %p183_p3 = scmp.ne.s32.totalorder %s30_s16, %s182_s26  ;;  %p188_p5 = scmp.lt.s32.totalorder %s182_s26, %s182_s26 }
   0xe   :  { %p189_p6 = por %p188_p5, %p187_p4 }
  0x10   :  { %p190_p7 = pnand %p189_p6, %p183_p3 }
  0x12   :  { %193 = shalt.err (!%p190_p7)
}
  0x13   :  { %32 = dma.hbm_to_vmem [thread:$0]  %s382_s1, 128, %s30_s16, [#allocation6]  }
  0x14   :  { %s194_s5 = scalar_lea.hbm %s381_s0, 256 }
  0x15   :  { %p195_p8 = scmp.ne.s32.totalorder %s381_s0, %s194_s5  ;;  %p198_p9 = scmp.lt.u32.totalorder %s194_s5, %s381_s0 }
  0x17   :  { %p200_p10 = pnand %p198_p9, %p195_p8 }
  0x19   :  { %203 = shalt.err (!%p200_p10)
}
  0x1a   :  { %s204_s10 = scalar_lea.vmem %s20_s18, 256  ;;  %p209_p12 = scmp.lt.s32.totalorder %s20_s18, %s20_s18 }
  0x1b   :  { %p205_p11 = scmp.ne.s32.totalorder %s20_s18, %s204_s10  ;;  %p210_p13 = scmp.lt.s32.totalorder %s204_s10, %s204_s10 }
  0x1d   :  { %p211_p0 = por %p210_p13, %p209_p12 }
  0x1f   :  { %p212_p1 = pnand %p211_p0, %p205_p11 }
  0x21   :  { %215 = shalt.err (!%p212_p1)
}
  0x22   :  { %22 = dma.hbm_to_vmem [thread:$0]  %s381_s0, 256, %s20_s18, [#allocation3]  }
  0x23   :  { %s292_s12 = smov [#allocation7]   ;;  %s293_s14 = smov [#allocation8]  }
  0x24   :  { %s39_s13 = sshll.u32 %s292_s12, 4  ;;  %s49_s15 = sshll.u32 %s293_s14, 4  ;;  %s40_s13 = int_to_ptr.vmem [resolvable:$true] %s39_s13  ;;  %s50_s15 = int_to_ptr.vmem [resolvable:$true] %s49_s15 }
  0x25   :  { %s216_s19 = scalar_lea.hbm %s383_s2, 128 }
  0x26   :  { %p217_p2 = scmp.ne.s32.totalorder %s383_s2, %s216_s19  ;;  %p220_p3 = scmp.lt.u32.totalorder %s216_s19, %s383_s2 }
  0x28   :  { %p222_p4 = pnand %p220_p3, %p217_p2 }
  0x2a   :  { %225 = shalt.err (!%p222_p4)
}
  0x2b   :  { %s226_s0 = scalar_lea.vmem %s40_s13, 128  ;;  %p231_p6 = scmp.lt.s32.totalorder %s40_s13, %s40_s13 }
  0x2c   :  { %p227_p5 = scmp.ne.s32.totalorder %s40_s13, %s226_s0  ;;  %p232_p7 = scmp.lt.s32.totalorder %s226_s0, %s226_s0 }
  0x2e   :  { %p233_p8 = por %p232_p7, %p231_p6 }
  0x30   :  { %p234_p9 = pnand %p233_p8, %p227_p5 }
  0x32   :  { %237 = shalt.err (!%p234_p9)
}
  0x33   :  { %42 = dma.hbm_to_vmem [thread:$0]  %s383_s2, 128, %s40_s13, [#allocation6]  }
  0x34   :  { %s238_s27 = scalar_lea.hbm %s384_s3, 128 }
  0x35   :  { %p239_p10 = scmp.ne.s32.totalorder %s384_s3, %s238_s27  ;;  %p242_p11 = scmp.lt.u32.totalorder %s238_s27, %s384_s3 }
  0x37   :  { %p244_p12 = pnand %p242_p11, %p239_p10 }
  0x39   :  { %247 = shalt.err (!%p244_p12)
}
  0x3a   :  { %s248_s6 = scalar_lea.vmem %s50_s15, 128  ;;  %p253_p0 = scmp.lt.s32.totalorder %s50_s15, %s50_s15 }
  0x3b   :  { %p249_p13 = scmp.ne.s32.totalorder %s50_s15, %s248_s6  ;;  %p254_p1 = scmp.lt.s32.totalorder %s248_s6, %s248_s6 }
  0x3d   :  { %p255_p2 = por %p254_p1, %p253_p0 }
  0x3f   :  { %p256_p3 = pnand %p255_p2, %p249_p13 }
  0x41   :  { %259 = shalt.err (!%p256_p3)
}
  0x42   :  { %52 = dma.hbm_to_vmem [thread:$0]  %s384_s3, 128, %s50_s15, [#allocation9]  }
  0x43   :  { %282 = dma.done.wait [#allocation3], 256  }
  0x44   :  { %283 = vsyncadd [#allocation3], 4294967040 }
  0x45   :  { %284 = dma.done.wait [#allocation6], 256  }
  0x46   :  { %285 = vsyncadd [#allocation6], 4294967040 }
  0x47   :  { %286 = dma.done.wait [#allocation9], 128  }
  0x48   :  { %287 = vsyncadd [#allocation9], 4294967168  ;;  %v65_v0 = vld [vmem:[#allocation2] sm:$0xff]  ;;  %v66_v1 = vld [vmem:[#allocation2 + $0x8] sm:$0xff]  ;;  %v77_v6 = vlaneseq  ;;  %vm97_vm0 = vcmask 64512   ;;  %v294_v19 = vmov 0  }
  0x49   :  { %v67_v2 = vadd.f32 %v66_v1, %v65_v0  ;;  %v70_v3 = vmul.f32 %v65_v0, %v65_v0  ;;  %v71_v4 = vmul.f32 %v66_v1, %v66_v1  ;;  %v75_v11 = vld [vmem:[#allocation8] sm:$0xff]  ;;  %168 = vset.pattern.permute.xlu0 %v294_v19  ;;  %169 = vset.pattern.permute.xlu1 %v294_v19  ;;  %v124_v28 = vld [vmem:[#allocation5] sm:$0xff]  ;;  %v126_v31 = vld [vmem:[#allocation7] sm:$0xff]  ;;  %s295_s3 = smov [#allocation10]  }
  0x4a   :  { %v78_v7 = vand.u32 127, %v77_v6  ;;  %v80_v8 = vshrl.u32 %v77_v6, 7  ;;  %s151_s8 = sshll.u32 %s295_s3, 4  ;;  %s152_s8 = int_to_ptr.vmem [resolvable:$true] %s151_s8 }
  0x4b   :  { %68 = vadd.xlane.f32.xlu0 %v67_v2  ;;  %v72_v5 = vadd.f32 %v71_v4, %v70_v3  ;;  %s260_s9 = scalar_lea.vmem %s152_s8, 256  ;;  %p265_p5 = scmp.lt.s32.totalorder %s152_s8, %s152_s8 }
  0x4c   :  { %v81_v9 = vsub.s32 %v78_v7, %v80_v8  ;;  %p261_p4 = scmp.ne.s32.totalorder %s152_s8, %s260_s9  ;;  %p266_p6 = scmp.lt.s32.totalorder %s260_s9, %s260_s9 }
  0x4e   :  { %p267_p7 = por %p266_p6, %p265_p5 }
  0x4f   :  { %73 = vadd.xlane.f32.xlu0 %v72_v5 }
  0x50   :  { %p268_p8 = pnand %p267_p7, %p261_p4 }
  0xd8   :  { %v69_v10 = vpop.xlane.xlu0 %68 }
  0xd9   :  { %v82_v12 = vrot.slane %v69_v10, %v81_v9 }
  0xdb   :  { %v96_v13 = vmul.f32 %v82_v12, %v75_v11 }
  0xdc   :  { %v74_v14 = vpop.xlane.xlu0 %73 }
  0xdd   :  { %v105_v15 = vrot.slane %v74_v14, %v81_v9  ;;  %v98_v16 = vsel %vm97_vm0, %v96_v13, 0.0 }
  0xde   :  { %99 = vadd.xlane.f32.xlu1 %v98_v16 }
  0xdf   :  { %v113_v17 = vmul.f32 %v105_v15, %v75_v11 }
  0xe1   :  { %v114_v18 = vsel %vm97_vm0, %v113_v17, 0.0 }
  0xe2   :  { %115 = vadd.xlane.f32.xlu1 %v114_v18 }
 0x16b   :  { %v100_v20 = vpop.xlane.xlu1 %99 }
 0x16c   :  { %v117_v21 = vmul.f32 0.001953125, %v100_v20 }
 0x16e   :  { %v119_v23 = vmul.f32 %v117_v21, %v117_v21 }
 0x16f   :  { %v116_v22 = vpop.xlane.xlu1 %115 }
 0x170   :  { %v118_v24 = vmul.f32 0.001953125, %v116_v22 }
 0x172   :  { %v120_v25 = vsub.f32 %v118_v24, %v119_v23 }
 0x174   :  { %v121_v26 = vmax.f32 %v120_v25, 0.0 }
 0x176   :  { %v122_v27 = vadd.f32 1e-05, %v121_v26 }
 0x178   :  { %170 = vrsqrt.f32 %v122_v27 }
 0x182   :  { %v171_v29 = vpop.eup %170 }
 0x183   :  { %v125_v30 = vmul.f32 %v171_v29, %v124_v28 }
 0x185   :  { %131 = vperm.xlu0 %168, %v125_v30   ;;  %v127_v32 = vmul.f32 %v125_v30, %v117_v21 }
 0x187   :  { %v128_v33 = vsub.f32 %v126_v31, %v127_v32 }
 0x189   :  { %138 = vperm.xlu1 %169, %v128_v33  }
 0x204   :  { %v132_v34 = vpop.permute.xlu0 %131 }
 0x205   :  { %v134_v35 = vmul.f32 %v132_v34, %v65_v0  ;;  %v135_v36 = vmul.f32 %v132_v34, %v66_v1 }
 0x208   :  { %v139_v37 = vpop.permute.xlu1 %138 }
 0x209   :  { %v141_v38 = vadd.f32 %v139_v37, %v134_v35  ;;  %v142_v39 = vadd.f32 %v139_v37, %v135_v36 }
 0x20b   :  { %143 = vst [vmem:[#allocation10] sm:$0xff] %v141_v38  ;;  %144 = vst [vmem:[#allocation10 + $0x8] sm:$0xff] %v142_v39 }
 0x20c   :  { %271 = shalt.err (!%p268_p8)
}
 0x20d   :  { %s272_s11 = scalar_lea.hbm %s385_s4, 256 }
 0x20e   :  { %p273_p9 = scmp.ne.s32.totalorder %s385_s4, %s272_s11  ;;  %p276_p10 = scmp.lt.u32.totalorder %s272_s11, %s385_s4 }
 0x210   :  { %p278_p11 = pnand %p276_p10, %p273_p9 }
 0x212   :  { %281 = shalt.err (!%p278_p11)
}
 0x213   :  { %154 = dma.vmem_to_hbm [thread:$0]  %s152_s8, 256, %s385_s4, [#allocation4]  }
 0x214   :  { %288 = dma.done.wait [#allocation4], 256  }
 0x215   :  { %289 = vsyncadd [#allocation4], 4294967040 }
 0x216   :  { %158 = vsyncpa [#allocation3], 1 }
 0x217   :  { %159 = vsyncpa [#allocation6], 1 }
 0x218   :  { %160 = vsyncpa [#allocation9], 1 }
 0x219   :  { %161 = vsyncpa [#allocation4], 1 }

</bundles_post_ra>
